<compile_context>
chip_gen: v7x
topology: tpu7x:2x2x1
jax: 0.10.0
libtpu: 0.0.40
codegen_flags: <defaults>
</compile_context>

<pallas_src>
import jax
import jax.numpy as jnp
from jax import lax
from jax.experimental import pallas as pl
from jax.experimental.pallas import tpu as pltpu

# Module hyper-parameters (from the PyTorch source).
INPUT_CHANNELS = 3
INPUT_HEIGHT = 32
INPUT_WIDTH = 32
HIDDEN_SIZE = 100
NUM_CLASSES = 3
BN_EPS = 1e-5

_HW = INPUT_HEIGHT * INPUT_WIDTH              # 1024
_IN_FEATURES = INPUT_CHANNELS * _HW           # 3072
_HIDDEN_PAD = 128                             # 100 -> 128 lanes
_CLASSES_PAD = 128                            # lane-dense output tile
_NEG_BIG = -1e30                              # "minus infinity" for padded logits
_ROW_GRAIN = 16                               # bf16-friendly sublane granularity
_MAX_TILE_ROWS = 1024                         # per-tile batch rows cap (all gens)


def _mlp_softmax_kernel(x_ref, w1_ref, b1_ref, w2_ref, b2_ref, out_ref):
    """Per-tile: fc1(+folded BN) -> ReLU -> fc2 -> softmax.

    x_ref  : (TN, 3072)  bf16 VMEM   (BN already folded into W1/b1)
    w1_ref : (3072, 128) bf16 VMEM   resident across the grid
    b1_ref : (1, 128)    f32  VMEM
    w2_ref : (128, 128)  f32  VMEM   (zero-padded rows/cols)
    b2_ref : (1, 128)    f32  VMEM   (padded classes = -1e30)
    out    : (TN, 128)   f32  VMEM   softmax over the 128 lanes
    """
    # bf16 x bf16 -> f32 accumulate: single-pass MXU on the big K=3072 matmul.
    h = jnp.dot(x_ref[...], w1_ref[...], preferred_element_type=jnp.float32)
    h = jnp.maximum(h + b1_ref[...], 0.0)

    logits = jnp.dot(h, w2_ref[...],
                     preferred_element_type=jnp.float32) + b2_ref[...]

    # softmax along lanes; padded classes have logit ~ -1e30 -> exp underflows
    # to exactly 0, so the result over the real 3 classes is unchanged.
    m = jnp.max(logits, axis=1, keepdims=True)
    e = jnp.exp(logits - m)
    denom = jnp.sum(e, axis=1, keepdims=True)
    out_ref[...] = e * pl.reciprocal(denom, approx=False)   # EUP, not VPU divide


def _round_up(x, m):
    return (x + m - 1) // m * m


def _choose_batch_tiling(n):
    """Pick (n_pad, tile_rows) so tile_rows divides n_pad with minimal padding.

    n_pad is a multiple of 16 (<= 15 junk rows).  tile_rows <= _MAX_TILE_ROWS,
    and when the batch allows it we keep >= 2 grid tiles so the parallel axis
    can shard across v7x's two TensorCores.  Only if no reasonable divisor
    exists for a very large batch do we accept a bounded (< 256 row) pad.
    """
    n_pad = _round_up(n, _ROW_GRAIN)
    cap = min(_MAX_TILE_ROWS, n_pad)
    if n_pad >= 2 * _ROW_GRAIN:
        cap = min(cap, n_pad // 2)            # >= 2 tiles when possible
    cap = max(_ROW_GRAIN, cap - cap % _ROW_GRAIN)

    tile = _ROW_GRAIN
    d = cap
    while d >= _ROW_GRAIN:
        if n_pad % d == 0:
            tile = d
            break
        d -= _ROW_GRAIN

    # Pathological divisor (e.g. prime-ish large batch): accept a small pad.
    if tile < 128 and n_pad > 1024:
        tile = 256
        n_pad = _round_up(n_pad, tile)
    return n_pad, tile


@jax.jit
def simple_nn_forward(x_nchw, gamma, beta, w1_t, b1, w2_t, b2):
    """x_nchw: (N, 3, 32, 32) f32 -> (N, 3) f32 softmax probabilities."""
    n = x_nchw.shape[0]

    # ---- training-mode BatchNorm2d batch statistics, ONE pass over x -------
    cnt = float(n * _HW)
    s1 = jnp.sum(x_nchw, axis=(0, 2, 3))                                 # (C,)
    s2 = jnp.sum(jnp.square(x_nchw), axis=(0, 2, 3))                     # (C,)
    mean = s1 / cnt
    var = jnp.maximum(s2 / cnt - jnp.square(mean), 0.0)   # biased var, clamped
    scale_c = gamma.reshape(-1) * lax.rsqrt(var + BN_EPS)                # (C,)
    shift_c = beta.reshape(-1) - mean * scale_c                          # (C,)

    # per-feature scale/shift in C-major flatten order (c*HW + h*W + w)
    s_feat = jnp.repeat(scale_c, _HW)                                    # (3072,)
    t_feat = jnp.repeat(shift_c, _HW)                                    # (3072,)

    # ---- fold BN affine into fc1, pad hidden 100->128, classes 3->128 ------
    w1f = w1_t * s_feat[:, None]                                         # (3072,100)
    b1f = b1.reshape(1, -1) + t_feat[None, :] @ w1_t                     # (1,100) f32
    w1p = jnp.pad(w1f, ((0, 0), (0, _HIDDEN_PAD - HIDDEN_SIZE))
                  ).astype(jnp.bfloat16)
    b1p = jnp.pad(b1f, ((0, 0), (0, _HIDDEN_PAD - HIDDEN_SIZE)))
    w2p = jnp.pad(w2_t, ((0, _HIDDEN_PAD - HIDDEN_SIZE),
                         (0, _CLASSES_PAD - NUM_CLASSES)))
    b2p = jnp.pad(b2.reshape(1, -1),
                  ((0, 0), (0, _CLASSES_PAD - NUM_CLASSES)),
                  constant_values=_NEG_BIG)

    # ---- tile the batch (bf16 stream, minimal padding) ----------------------
    # The bf16 cast fuses with the statistics pass (same HBM read of x).
    x_flat = x_nchw.reshape(n, _IN_FEATURES).astype(jnp.bfloat16)
    n_pad, tn = _choose_batch_tiling(n)
    if n_pad != n:
        x_flat = jnp.pad(x_flat, ((0, n_pad - n), (0, 0)))

    out_padded = pl.pallas_call(
        _mlp_softmax_kernel,
        out_shape=jax.ShapeDtypeStruct((n_pad, _CLASSES_PAD), jnp.float32),
        grid_spec=pltpu.PrefetchScalarGridSpec(
            num_scalar_prefetch=0,
            grid=(n_pad // tn,),
            in_specs=[
                pl.BlockSpec((tn, _IN_FEATURES), lambda i: (i, 0)),
                pl.BlockSpec((_IN_FEATURES, _HIDDEN_PAD), lambda i: (0, 0)),
                pl.BlockSpec((1, _HIDDEN_PAD), lambda i: (0, 0)),
                pl.BlockSpec((_HIDDEN_PAD, _CLASSES_PAD), lambda i: (0, 0)),
                pl.BlockSpec((1, _CLASSES_PAD), lambda i: (0, 0)),
            ],
            out_specs=pl.BlockSpec((tn, _CLASSES_PAD), lambda i: (i, 0)),
        ),
        compiler_params=pltpu.CompilerParams(
            dimension_semantics=("parallel",),
            vmem_limit_bytes=48 * 1024 * 1024,
        ),
    )(x_flat, w1p, b1p, w2p, b2p)

    return out_padded[:n, :NUM_CLASSES]


def _init_params(key):
    """Parameter init mirroring PyTorch default shapes/bounds."""
    k1, k2, k3, k4 = jax.random.split(key, 4)
    bound1 = 1.0 / jnp.sqrt(float(_IN_FEATURES))
    bound2 = 1.0 / jnp.sqrt(float(HIDDEN_SIZE))
    # Stored transposed (in_features, out_features) for the kernel.
    w1_t = jax.random.uniform(k1, (_IN_FEATURES, HIDDEN_SIZE),
                              minval=-bound1, maxval=bound1, dtype=jnp.float32)
    b1 = jax.random.uniform(k2, (HIDDEN_SIZE,),
                            minval=-bound1, maxval=bound1, dtype=jnp.float32)
    w2_t = jax.random.uniform(k3, (HIDDEN_SIZE, NUM_CLASSES),
                              minval=-bound2, maxval=bound2, dtype=jnp.float32)
    b2 = jax.random.uniform(k4, (NUM_CLASSES,),
                            minval=-bound2, maxval=bound2, dtype=jnp.float32)
    gamma = jnp.ones((INPUT_CHANNELS,), jnp.float32)    # BN weight default
    beta = jnp.zeros((INPUT_CHANNELS,), jnp.float32)    # BN bias default
    return gamma, beta, w1_t, b1, w2_t, b2


def _reference_forward(x_nchw, gamma, beta, w1_t, b1, w2_t, b2):
    """Pure-JAX f32 reference (training-mode BN, biased variance)."""
    mean = jnp.mean(x_nchw, axis=(0, 2, 3), keepdims=True)
    var = jnp.mean((x_nchw - mean) ** 2, axis=(0, 2, 3), keepdims=True)
    xn = (x_nchw - mean) / jnp.sqrt(var + BN_EPS)
    xn = xn * gamma.reshape(1, -1, 1, 1) + beta.reshape(1, -1, 1, 1)
    flat = xn.reshape(x_nchw.shape[0], -1)
    h = jnp.maximum(flat @ w1_t + b1.reshape(1, -1), 0.0)
    logits = h @ w2_t + b2.reshape(1, -1)
    return jax.nn.softmax(logits, axis=1)


if __name__ == "__main__":
    key = jax.random.PRNGKey(0)
    kx, kp, kx2, kg, kb = jax.random.split(key, 5)

    gamma, beta, w1_t, b1, w2_t, b2 = _init_params(kp)

    # --- primary small-shape check (batch=2, single tile) -------------------
    # bf16 x/W1 stream (f32 accumulation) gives ~1e-3 logit error vs the pure
    # f32 reference, so the probability tolerance is 5e-3 absolute.
    batch = 2
    x = jax.random.normal(
        kx, (batch, INPUT_CHANNELS, INPUT_HEIGHT, INPUT_WIDTH), jnp.float32)
    out = jax.block_until_ready(
        simple_nn_forward(x, gamma, beta, w1_t, b1, w2_t, b2))
    ref = _reference_forward(x, gamma, beta, w1_t, b1, w2_t, b2)
    assert out.shape == (batch, NUM_CLASSES)
    assert jnp.allclose(out, ref, atol=5e-3, rtol=0.0)
    assert jnp.allclose(jnp.sum(out, axis=1), 1.0, atol=1e-5)

    # --- tiled-path check (batch=384 -> TN=192, grid of 2 tiles, no batch
    #     pad; non-default BN affine to exercise the fold) --------------------
    batch2 = 384
    x2 = jax.random.normal(
        kx2, (batch2, INPUT_CHANNELS, INPUT_HEIGHT, INPUT_WIDTH), jnp.float32)
    gamma2 = jax.random.uniform(kg, (INPUT_CHANNELS,), minval=0.5, maxval=1.5)
    beta2 = jax.random.uniform(kb, (INPUT_CHANNELS,), minval=-0.5, maxval=0.5)
    out2 = jax.block_until_ready(
        simple_nn_forward(x2, gamma2, beta2, w1_t, b1, w2_t, b2))
    ref2 = _reference_forward(x2, gamma2, beta2, w1_t, b1, w2_t, b2)
    assert out2.shape == (batch2, NUM_CLASSES)
    assert jnp.allclose(out2, ref2, atol=5e-3, rtol=0.0)
    assert jnp.allclose(jnp.sum(out2, axis=1), 1.0, atol=1e-5)

    print("KERNEL_OK")
</pallas_src>

<mosaic_0001>
module attributes {stable_mosaic.version = 11 : i64} {
  func.func @_mlp_softmax_kernel(%arg0: i32, %arg1: memref<16x3072xbf16, #tpu.memory_space<vmem>>, %arg2: memref<3072x128xbf16, #tpu.memory_space<vmem>>, %arg3: memref<1x128xf32, #tpu.memory_space<vmem>>, %arg4: memref<128x128xf32, #tpu.memory_space<vmem>>, %arg5: memref<1x128xf32, #tpu.memory_space<vmem>>, %arg6: memref<16x128xf32, #tpu.memory_space<vmem>>) attributes {dimension_semantics = [#tpu.dimension_semantics<parallel>], iteration_bounds = array<i64: 1>, scalar_prefetch = 0 : i64, scratch_operands = 0 : i64, tpu.core_type = #tpu.core_type<tc>, window_params = [{transform_indices = @transform_0, window_bounds = array<i64: 16, 3072>}, {pipeline_mode = #tpu.pipeline_mode<synchronous>, transform_indices = @transform_1, window_bounds = array<i64: 3072, 128>}, {pipeline_mode = #tpu.pipeline_mode<synchronous>, transform_indices = @transform_2, window_bounds = array<i64: 1, 128>}, {pipeline_mode = #tpu.pipeline_mode<synchronous>, transform_indices = @transform_3, window_bounds = array<i64: 128, 128>}, {pipeline_mode = #tpu.pipeline_mode<synchronous>, transform_indices = @transform_4, window_bounds = array<i64: 1, 128>}, {transform_indices = @transform_5, window_bounds = array<i64: 16, 128>}]} {
    %c0 = arith.constant 0 : index
    %c0_0 = arith.constant 0 : index
    %0 = vector.load %arg1[%c0, %c0_0] : memref<16x3072xbf16, #tpu.memory_space<vmem>>, vector<16x3072xbf16>
    %c0_1 = arith.constant 0 : index
    %c0_2 = arith.constant 0 : index
    %1 = vector.load %arg2[%c0_1, %c0_2] : memref<3072x128xbf16, #tpu.memory_space<vmem>>, vector<3072x128xbf16>
    %cst = arith.constant dense<0.000000e+00> : vector<16x128xf32>
    %2 = tpu.matmul %0, %1, %cst {dimension_numbers = #tpu.dot_dimension_numbers<[1], [0], [0], [1], [0, 0, 1, 1], [], []>} : vector<16x3072xbf16>, vector<3072x128xbf16>, vector<16x128xf32> -> vector<16x128xf32>
    %c0_3 = arith.constant 0 : index
    %c0_4 = arith.constant 0 : index
    %3 = vector.load %arg3[%c0_3, %c0_4] : memref<1x128xf32, #tpu.memory_space<vmem>>, vector<1x128xf32>
    %4 = vector.broadcast %3 : vector<1x128xf32> to vector<16x128xf32>
    %5 = arith.addf %2, %4 : vector<16x128xf32>
    %cst_5 = arith.constant 0.000000e+00 : f32
    %6 = vector.broadcast %cst_5 : f32 to vector<16x128xf32>
    %7 = arith.maximumf %5, %6 : vector<16x128xf32>
    %c0_6 = arith.constant 0 : index
    %c0_7 = arith.constant 0 : index
    %8 = vector.load %arg4[%c0_6, %c0_7] : memref<128x128xf32, #tpu.memory_space<vmem>>, vector<128x128xf32>
    %cst_8 = arith.constant dense<0.000000e+00> : vector<16x128xf32>
    %9 = tpu.matmul %7, %8, %cst_8 {dimension_numbers = #tpu.dot_dimension_numbers<[1], [0], [0], [1], [0, 0, 1, 1], [], []>} : vector<16x128xf32>, vector<128x128xf32>, vector<16x128xf32> -> vector<16x128xf32>
    %c0_9 = arith.constant 0 : index
    %c0_10 = arith.constant 0 : index
    %10 = vector.load %arg5[%c0_9, %c0_10] : memref<1x128xf32, #tpu.memory_space<vmem>>, vector<1x128xf32>
    %11 = vector.broadcast %10 : vector<1x128xf32> to vector<16x128xf32>
    %12 = arith.addf %9, %11 : vector<16x128xf32>
    %cst_11 = arith.constant dense<0xFF800000> : vector<16xf32>
    %13 = vector.multi_reduction <maximumf>, %12, %cst_11 [1] : vector<16x128xf32> to vector<16xf32>
    %14 = vector.shape_cast %13 : vector<16xf32> to vector<16x1xf32>
    %15 = vector.broadcast %14 : vector<16x1xf32> to vector<16x128xf32>
    %16 = arith.subf %12, %15 : vector<16x128xf32>
    %17 = math.exp %16 : vector<16x128xf32>
    %cst_12 = arith.constant dense<0.000000e+00> : vector<16xf32>
    %18 = vector.multi_reduction <add>, %17, %cst_12 [1] : vector<16x128xf32> to vector<16xf32>
    %19 = vector.shape_cast %18 : vector<16xf32> to vector<16x1xf32>
    %20 = tpu.reciprocal %19 : vector<16x1xf32> -> vector<16x1xf32>
    %21 = vector.broadcast %20 : vector<16x1xf32> to vector<16x128xf32>
    %22 = arith.mulf %17, %21 : vector<16x128xf32>
    %c0_13 = arith.constant 0 : index
    %c0_14 = arith.constant 0 : index
    %23 = vector.load %arg6[%c0_13, %c0_14] : memref<16x128xf32, #tpu.memory_space<vmem>>, vector<16x128xf32>
    tpu.vector_store %arg6[%c0_13, %c0_14], %22 {strides = array<i32>} : memref<16x128xf32, #tpu.memory_space<vmem>>, vector<16x128xf32>,
    return
  }
  func.func @transform_0(%arg0: i32) -> (i32, i32) {
    %c0_i32 = arith.constant 0 : i32
    %c0_i32_0 = arith.constant 0 : i32
    return %arg0, %c0_i32 : i32, i32
  }
  func.func @transform_1(%arg0: i32) -> (i32, i32) {
    %c0_i32 = arith.constant 0 : i32
    %c0_i32_0 = arith.constant 0 : i32
    %c0_i32_1 = arith.constant 0 : i32
    return %c0_i32, %c0_i32_0 : i32, i32
  }
  func.func @transform_2(%arg0: i32) -> (i32, i32) {
    %c0_i32 = arith.constant 0 : i32
    %c0_i32_0 = arith.constant 0 : i32
    %c0_i32_1 = arith.constant 0 : i32
    return %c0_i32, %c0_i32_0 : i32, i32
  }
  func.func @transform_3(%arg0: i32) -> (i32, i32) {
    %c0_i32 = arith.constant 0 : i32
    %c0_i32_0 = arith.constant 0 : i32
    %c0_i32_1 = arith.constant 0 : i32
    return %c0_i32, %c0_i32_0 : i32, i32
  }
  func.func @transform_4(%arg0: i32) -> (i32, i32) {
    %c0_i32 = arith.constant 0 : i32
    %c0_i32_0 = arith.constant 0 : i32
    %c0_i32_1 = arith.constant 0 : i32
    return %c0_i32, %c0_i32_0 : i32, i32
  }
  func.func @transform_5(%arg0: i32) -> (i32, i32) {
    %c0_i32 = arith.constant 0 : i32
    %c0_i32_0 = arith.constant 0 : i32
    return %arg0, %c0_i32 : i32, i32
  }
}

</mosaic_0001>

<bundles_post_ra>
// kernel: mul.9
= control target key start
LH: loop header
LB: loop body
LE: loop exit
PB: predicated region body
PF: predicated region fallthrough
CT: control target
= control target key end

     0   :  { %s148_s0 = inlined_call_operand.vmem [shape: f32[3,1024], index: 0, kind: input, shape index: {}]   ;;  %s149_s1 = inlined_call_operand.vmem [shape: f32[3072], index: 1, kind: output, shape index: {}]  }
   0x1   :  { %v76_v0 = vld [vmem:[%s148_s0 + $0x1c] sm:$0xf]  ;;  %v77_v1 = vld [vmem:[%s148_s0 + $0x18] sm:$0xf]  ;;  %v78_v2 = vld [vmem:[%s148_s0 + $0x14] sm:$0xf] }
   0x2   :  { %8 = vst [vmem:[#allocation0 + $0x38] sm:$0xf] %v76_v0  ;;  %13 = vst [vmem:[#allocation0 + $0x30] sm:$0xf] %v77_v1  ;;  %v79_v3 = vld [vmem:[%s148_s0 + $0x10] sm:$0xf] }
   0x3   :  { %18 = vst [vmem:[#allocation0 + $0x28] sm:$0xf] %v78_v2  ;;  %v80_v4 = vld [vmem:[%s148_s0 + $0xc] sm:$0xf]  ;;  %v81_v5 = vld [vmem:[%s148_s0 + $0x8] sm:$0xf] }
   0x4   :  { %23 = vst [vmem:[#allocation0 + $0x20] sm:$0xf] %v79_v3  ;;  %28 = vst [vmem:[#allocation0 + $0x18] sm:$0xf] %v80_v4  ;;  %v82_v6 = vld [vmem:[%s148_s0 + $0x4] sm:$0xf] }
   0x5   :  { %33 = vst [vmem:[#allocation0 + $0x10] sm:$0xf] %v81_v5  ;;  %v38_v7 = vld [vmem:[%s148_s0] sm:$0xf]  ;;  %37 = vst [vmem:[#allocation0 + $0x8] sm:$0xf] %v82_v6 }
   0x6   :  { %39 = vst [vmem:[#allocation0] sm:$0xf] %v38_v7 }
   0x9   :  { %v63_v9 = vld [vmem:[#allocation0 + $0x30] sm:$0x7]   ;;  %v67_v10 = vld [vmem:[#allocation0 + $0x38] sm:$0x7]  }
   0xa   :  { %v59_v8 = vld [vmem:[#allocation0 + $0x28] sm:$0x7]   ;;  %88 = vst [vmem:[%s149_s1 + $0x6] ss:$8 sm:$0x7] %v63_v9  }
   0xb   :  { %v51_v12 = vld [vmem:[#allocation0 + $0x18] sm:$0x7]   ;;  %v55_v13 = vld [vmem:[#allocation0 + $0x20] sm:$0x7]  }
   0xc   :  { %v47_v11 = vld [vmem:[#allocation0 + $0x10] sm:$0x7]   ;;  %87 = vst [vmem:[%s149_s1 + $0x5] ss:$8 sm:$0x7] %v59_v8  }
   0xd   :  { %89 = vst [vmem:[%s149_s1 + $0x7] ss:$8 sm:$0x7] %v67_v10   ;;  %v40_v14 = vld [vmem:[#allocation0] sm:$0x7]  }
   0xe   :  { %v43_v15 = vld [vmem:[#allocation0 + $0x8] sm:$0x7]   ;;  %84 = vst [vmem:[%s149_s1 + $0x2] ss:$8 sm:$0x7] %v47_v11  }
   0xf   :  { %85 = vst [vmem:[%s149_s1 + $0x3] ss:$8 sm:$0x7] %v51_v12   ;;  %86 = vst [vmem:[%s149_s1 + $0x4] ss:$8 sm:$0x7] %v55_v13  }
  0x10   :  { %41 = vst [vmem:[%s149_s1] ss:$8 sm:$0x7] %v40_v14   ;;  %83 = vst [vmem:[%s149_s1 + $0x1] ss:$8 sm:$0x7] %v43_v15  }

// kernel: simple_nn_forward.1
= control target key start
LH: loop header
LB: loop body
LE: loop exit
PB: predicated region body
PF: predicated region fallthrough
CT: control target
= control target key end

     0   :  { %s3829_s1 = inlined_call_operand.vmem [shape: bf16[3072,128], index: 1, kind: input, shape index: {}]   ;;  %s3830_s0 = inlined_call_operand.vmem [shape: bf16[16,3072], index: 0, kind: input, shape index: {}]   ;;  %s3831_s2 = inlined_call_operand.vmem [shape: f32[1,128], index: 2, kind: input, shape index: {}]   ;;  %s3832_s3 = inlined_call_operand.vmem [shape: f32[128,128], index: 3, kind: input, shape index: {}]   ;;  %s3833_s4 = inlined_call_operand.vmem [shape: f32[1,128], index: 4, kind: input, shape index: {}]   ;;  %s3834_s5 = inlined_call_operand.vmem [shape: f32[16,128], index: 5, kind: output, shape index: {}]  }
   0x1   :  { %v2891_v0 = vld [vmem:[%s3829_s1 + $0x40] sm:$0xff]   ;;  %v2895_v4 = vld [vmem:[%s3829_s1 + $0x48] sm:$0xff]   ;;  %v2899_v8 = vld [vmem:[%s3829_s1 + $0x50] sm:$0xff]  }
   0x2   :  { %v2892_v1 = vld [vmem:[%s3829_s1 + $0xc0] sm:$0xff]   ;;  %2542 = vmatprep.subr.bf16.mxu0 %v2891_v0  ;;  %v2896_v5 = vld [vmem:[%s3829_s1 + $0xc8] sm:$0xff]   ;;  %v2900_v9 = vld [vmem:[%s3829_s1 + $0xd0] sm:$0xff]  }
   0x3   :  { %v2893_v2 = vld [vmem:[%s3829_s1] sm:$0xff]   ;;  %2564 = vmatprep.subr.bf16.mxu1 %v2892_v1  ;;  %v2897_v6 = vld [vmem:[%s3829_s1 + $0x8] sm:$0xff]   ;;  %v2901_v10 = vld [vmem:[%s3829_s1 + $0x10] sm:$0xff]  }
   0x4   :  { %v2894_v3 = vld [vmem:[%s3829_s1 + $0x80] sm:$0xff]   ;;  %2543 = vmatpush3.bf16.msra.mxu0 %v2893_v2  ;;  %v2898_v7 = vld [vmem:[%s3829_s1 + $0x88] sm:$0xff]   ;;  %v2902_v11 = vld [vmem:[%s3829_s1 + $0x90] sm:$0xff]  }
   0x5   :  { %2565 = vmatpush3.bf16.msra.mxu1 %v2894_v3  ;;  %2544 = vmatprep.subr.bf16.mxu0 %v2895_v4  ;;  %v2903_v12 = vld [vmem:[%s3829_s1 + $0x58] sm:$0xff]   ;;  %v2907_v16 = vld [vmem:[%s3829_s1 + $0x60] sm:$0xff]   ;;  %v2911_v20 = vld [vmem:[%s3829_s1 + $0x68] sm:$0xff]  }
   0x6   :  { %2566 = vmatprep.subr.bf16.mxu1 %v2896_v5  ;;  %v2904_v13 = vld [vmem:[%s3829_s1 + $0xd8] sm:$0xff]   ;;  %v2908_v17 = vld [vmem:[%s3829_s1 + $0xe0] sm:$0xff]   ;;  %v2912_v21 = vld [vmem:[%s3829_s1 + $0xe8] sm:$0xff]  }
   0x7   :  { %v2905_v14 = vld [vmem:[%s3829_s1 + $0x18] sm:$0xff]   ;;  %v2909_v18 = vld [vmem:[%s3829_s1 + $0x20] sm:$0xff]   ;;  %v2913_v22 = vld [vmem:[%s3829_s1 + $0x28] sm:$0xff]  }
   0x8   :  { %2545 = vmatpush3.bf16.msra.mxu0 %v2897_v6  ;;  %v2906_v15 = vld [vmem:[%s3829_s1 + $0x98] sm:$0xff]   ;;  %v2910_v19 = vld [vmem:[%s3829_s1 + $0xa0] sm:$0xff]   ;;  %v2914_v23 = vld [vmem:[%s3829_s1 + $0xa8] sm:$0xff]  }
   0x9   :  { %2567 = vmatpush3.bf16.msra.mxu1 %v2898_v7  ;;  %2546 = vmatprep.subr.bf16.mxu0 %v2899_v8  ;;  %v2915_v24 = vld [vmem:[%s3829_s1 + $0x70] sm:$0xff]   ;;  %v2919_v28 = vld [vmem:[%s3829_s1 + $0x78] sm:$0xff]   ;;  %v21_v32 = vld [vmem:[%s3830_s0] sm:$0xff] }
   0xa   :  { %2568 = vmatprep.subr.bf16.mxu1 %v2900_v9  ;;  %v2916_v25 = vld [vmem:[%s3829_s1 + $0xf0] sm:$0xff]   ;;  %v2920_v29 = vld [vmem:[%s3829_s1 + $0xf8] sm:$0xff]   ;;  %v33_v33 = vld [vmem:[%s3830_s0 + $0x60] sm:$0xff] }
   0xb   :  { %v2917_v26 = vld [vmem:[%s3829_s1 + $0x30] sm:$0xff]   ;;  %v2921_v30 = vld [vmem:[%s3829_s1 + $0x38] sm:$0xff]   ;;  %v22_v34 = vld [vmem:[%s3830_s0 + $0x8] sm:$0xff]  ;;  %v2325_v35 = vcombine.low %v21_v32, %v33_v33  ;;  %v2326_v36 = vcombine.high %v21_v32, %v33_v33 }
   0xc   :  { %2547 = vmatpush3.bf16.msra.mxu0 %v2901_v10  ;;  %v2918_v27 = vld [vmem:[%s3829_s1 + $0xb0] sm:$0xff]   ;;  %v2922_v31 = vld [vmem:[%s3829_s1 + $0xb8] sm:$0xff]   ;;  %v34_v37 = vld [vmem:[%s3830_s0 + $0x68] sm:$0xff] }
   0xd   :  { %2569 = vmatpush3.bf16.msra.mxu1 %v2902_v11  ;;  %2548 = vmatprep.subr.bf16.mxu0 %v2903_v12  ;;  %v2327_v38 = vcombine.low %v22_v34, %v34_v37  ;;  %v2328_v39 = vcombine.high %v22_v34, %v34_v37  ;;  %v2923_v40 = vld [vmem:[%s3829_s1 + $0x140] sm:$0xff]   ;;  %v2927_v44 = vld [vmem:[%s3829_s1 + $0x148] sm:$0xff]   ;;  %v2931_v48 = vld [vmem:[%s3829_s1 + $0x150] sm:$0xff]  }
   0xe   :  { %2570 = vmatprep.subr.bf16.mxu1 %v2904_v13  ;;  %1740 = vmatprep.mubr.bf16.mxu0 %v2326_v36  ;;  %v2924_v41 = vld [vmem:[%s3829_s1 + $0x1c0] sm:$0xff]   ;;  %v2928_v45 = vld [vmem:[%s3829_s1 + $0x1c8] sm:$0xff]   ;;  %v2932_v49 = vld [vmem:[%s3829_s1 + $0x1d0] sm:$0xff]  }
   0xf   :  { %1781 = vmatprep.mubr.bf16.mxu1 %v2328_v39  ;;  %v2925_v42 = vld [vmem:[%s3829_s1 + $0x100] sm:$0xff]   ;;  %v2929_v46 = vld [vmem:[%s3829_s1 + $0x108] sm:$0xff]   ;;  %v2933_v50 = vld [vmem:[%s3829_s1 + $0x110] sm:$0xff]  }
  0x10   :  { %2549 = vmatpush3.bf16.msra.mxu0 %v2905_v14  ;;  %v2926_v43 = vld [vmem:[%s3829_s1 + $0x180] sm:$0xff]   ;;  %v2930_v47 = vld [vmem:[%s3829_s1 + $0x188] sm:$0xff]   ;;  %v2934_v51 = vld [vmem:[%s3829_s1 + $0x190] sm:$0xff]  }
  0x11   :  { %2571 = vmatpush3.bf16.msra.mxu1 %v2906_v15  ;;  %2550 = vmatprep.subr.bf16.mxu0 %v2907_v16  ;;  %v2935_v52 = vld [vmem:[%s3829_s1 + $0x158] sm:$0xff]   ;;  %v2939_v56 = vld [vmem:[%s3829_s1 + $0x160] sm:$0xff]   ;;  %v2943_v60 = vld [vmem:[%s3829_s1 + $0x168] sm:$0xff]  }
  0x12   :  { %2572 = vmatprep.subr.bf16.mxu1 %v2908_v17  ;;  %v2936_v53 = vld [vmem:[%s3829_s1 + $0x1d8] sm:$0xff]   ;;  %v2940_v57 = vld [vmem:[%s3829_s1 + $0x1e0] sm:$0xff]   ;;  %v2944_v61 = vld [vmem:[%s3829_s1 + $0x1e8] sm:$0xff]  }
  0x13   :  { %v2937_v54 = vld [vmem:[%s3829_s1 + $0x118] sm:$0xff]   ;;  %v2941_v58 = vld [vmem:[%s3829_s1 + $0x120] sm:$0xff]   ;;  %v2945_v62 = vld [vmem:[%s3829_s1 + $0x128] sm:$0xff]  }
  0x14   :  { %2551 = vmatpush3.bf16.msra.mxu0 %v2909_v18  ;;  %v2938_v55 = vld [vmem:[%s3829_s1 + $0x198] sm:$0xff]   ;;  %v2942_v59 = vld [vmem:[%s3829_s1 + $0x1a0] sm:$0xff]   ;;  %v2946_v63 = vld [vmem:[%s3829_s1 + $0x1a8] sm:$0xff]  }
  0x15   :  { %2573 = vmatpush3.bf16.msra.mxu1 %v2910_v19  ;;  %2552 = vmatprep.subr.bf16.mxu0 %v2911_v20  ;;  %v2947_v0 = vld [vmem:[%s3829_s1 + $0x170] sm:$0xff]   ;;  %v2951_v4 = vld [vmem:[%s3829_s1 + $0x178] sm:$0xff]   ;;  %v2955_v16 = vld [vmem:[%s3829_s1 + $0x240] sm:$0xff]  }
  0x16   :  { %2574 = vmatprep.subr.bf16.mxu1 %v2912_v21  ;;  %v2948_v1 = vld [vmem:[%s3829_s1 + $0x1f0] sm:$0xff]   ;;  %v2952_v5 = vld [vmem:[%s3829_s1 + $0x1f8] sm:$0xff]   ;;  %v2956_v17 = vld [vmem:[%s3829_s1 + $0x2c0] sm:$0xff]  }
  0x17   :  { %v2949_v2 = vld [vmem:[%s3829_s1 + $0x130] sm:$0xff]   ;;  %v2953_v6 = vld [vmem:[%s3829_s1 + $0x138] sm:$0xff]   ;;  %v2957_v18 = vld [vmem:[%s3829_s1 + $0x200] sm:$0xff]  }
  0x18   :  { %2553 = vmatpush3.bf16.msra.mxu0 %v2913_v22  ;;  %v2950_v3 = vld [vmem:[%s3829_s1 + $0x1b0] sm:$0xff]   ;;  %v2954_v7 = vld [vmem:[%s3829_s1 + $0x1b8] sm:$0xff]   ;;  %v2958_v19 = vld [vmem:[%s3829_s1 + $0x280] sm:$0xff]  }
  0x19   :  { %2575 = vmatpush3.bf16.msra.mxu1 %v2914_v23  ;;  %2554 = vmatprep.subr.bf16.mxu0 %v2915_v24  ;;  %v23_v8 = vld [vmem:[%s3830_s0 + $0x10] sm:$0xff]  ;;  %v24_v12 = vld [vmem:[%s3830_s0 + $0x18] sm:$0xff]  ;;  %v2959_v20 = vld [vmem:[%s3829_s1 + $0x248] sm:$0xff]  }
  0x1a   :  { %2576 = vmatprep.subr.bf16.mxu1 %v2916_v25  ;;  %v35_v9 = vld [vmem:[%s3830_s0 + $0x70] sm:$0xff]  ;;  %v36_v13 = vld [vmem:[%s3830_s0 + $0x78] sm:$0xff]  ;;  %v2960_v21 = vld [vmem:[%s3829_s1 + $0x2c8] sm:$0xff]  }
  0x1b   :  { %v2329_v10 = vcombine.low %v23_v8, %v35_v9  ;;  %v2330_v11 = vcombine.high %v23_v8, %v35_v9  ;;  %v2331_v14 = vcombine.low %v24_v12, %v36_v13  ;;  %v2332_v15 = vcombine.high %v24_v12, %v36_v13  ;;  %v2961_v22 = vld [vmem:[%s3829_s1 + $0x208] sm:$0xff]   ;;  %v2963_v24 = vld [vmem:[%s3829_s1 + $0x250] sm:$0xff]   ;;  %v2971_v32 = vld [vmem:[%s3829_s1 + $0x260] sm:$0xff]  }
  0x1c   :  { %2555 = vmatpush3.bf16.msra.mxu0 %v2917_v26  ;;  %v2962_v23 = vld [vmem:[%s3829_s1 + $0x288] sm:$0xff]   ;;  %v2964_v25 = vld [vmem:[%s3829_s1 + $0x2d0] sm:$0xff]   ;;  %v2972_v33 = vld [vmem:[%s3829_s1 + $0x2e0] sm:$0xff]  }
  0x1d   :  { %2577 = vmatpush3.bf16.msra.mxu1 %v2918_v27  ;;  %2556 = vmatprep.subr.bf16.mxu0 %v2919_v28  ;;  %v2965_v26 = vld [vmem:[%s3829_s1 + $0x210] sm:$0xff]   ;;  %v2967_v28 = vld [vmem:[%s3829_s1 + $0x258] sm:$0xff]   ;;  %v2973_v34 = vld [vmem:[%s3829_s1 + $0x220] sm:$0xff]  }
  0x1e   :  { %2578 = vmatprep.subr.bf16.mxu1 %v2920_v29  ;;  %v2966_v27 = vld [vmem:[%s3829_s1 + $0x290] sm:$0xff]   ;;  %v2968_v29 = vld [vmem:[%s3829_s1 + $0x2d8] sm:$0xff]   ;;  %v2975_v36 = vld [vmem:[%s3829_s1 + $0x268] sm:$0xff]  }
  0x1f   :  { %v2976_v37 = vld [vmem:[%s3829_s1 + $0x2e8] sm:$0xff]   ;;  %v3003_v8 = vld [vmem:[%s3829_s1 + $0x360] sm:$0xff]  }
  0x20   :  { %2557 = vmatpush3.bf16.msra.mxu0 %v2921_v30  ;;  %v2969_v30 = vld [vmem:[%s3829_s1 + $0x218] sm:$0xff]   ;;  %v2978_v39 = vld [vmem:[%s3829_s1 + $0x2a8] sm:$0xff]   ;;  %v3004_v9 = vld [vmem:[%s3829_s1 + $0x3e0] sm:$0xff]  }
  0x21   :  { %2579 = vmatpush3.bf16.msra.mxu1 %v2922_v31  ;;  %2586 = vmatprep.subr.bf16.mxu0 %v2923_v40  ;;  %v2970_v31 = vld [vmem:[%s3829_s1 + $0x298] sm:$0xff]   ;;  %v2979_v40 = vld [vmem:[%s3829_s1 + $0x270] sm:$0xff]   ;;  %v3007_v12 = vld [vmem:[%s3829_s1 + $0x368] sm:$0xff]  }
  0x22   :  { %2608 = vmatprep.subr.bf16.mxu1 %v2924_v41  ;;  %v2980_v41 = vld [vmem:[%s3829_s1 + $0x2f0] sm:$0xff]   ;;  %v3008_v13 = vld [vmem:[%s3829_s1 + $0x3e8] sm:$0xff]  }
  0x23   :  { %1741 = vmatmul.mubr.bf16.vlgmr.msra.gmra.mrb[0].mxu0 %v2325_v35  ;;  %v2974_v35 = vld [vmem:[%s3829_s1 + $0x2a0] sm:$0xff]  }
  0x24   :  { %1782 = vmatmul.mubr.bf16.vlgmr.msra.gmra.mrb[0].mxu1 %v2327_v38  ;;  %2587 = vmatpush3.bf16.msra.mxu0 %v2925_v42  ;;  %v2977_v38 = vld [vmem:[%s3829_s1 + $0x228] sm:$0xff]   ;;  %v2981_v42 = vld [vmem:[%s3829_s1 + $0x230] sm:$0xff]  }
  0x25   :  { %2609 = vmatpush3.bf16.msra.mxu1 %v2926_v43  ;;  %2588 = vmatprep.subr.bf16.mxu0 %v2927_v44  ;;  %v2982_v43 = vld [vmem:[%s3829_s1 + $0x2b0] sm:$0xff]   ;;  %v2983_v44 = vld [vmem:[%s3829_s1 + $0x278] sm:$0xff]  }
  0x26   :  { %2610 = vmatprep.subr.bf16.mxu1 %v2928_v45  ;;  %1822 = vmatprep.mubr.bf16.mxu0 %v2330_v11  ;;  %v2984_v45 = vld [vmem:[%s3829_s1 + $0x2f8] sm:$0xff]   ;;  %v3006_v11 = vld [vmem:[%s3829_s1 + $0x3a0] sm:$0xff]  }
  0x27   :  { %1863 = vmatprep.mubr.bf16.mxu1 %v2332_v15  ;;  %v3010_v15 = vld [vmem:[%s3829_s1 + $0x3a8] sm:$0xff]  }
  0x28   :  { %2589 = vmatpush3.bf16.msra.mxu0 %v2929_v46  ;;  %v2985_v46 = vld [vmem:[%s3829_s1 + $0x238] sm:$0xff]  }
  0x29   :  { %2611 = vmatpush3.bf16.msra.mxu1 %v2930_v47  ;;  %2590 = vmatprep.subr.bf16.mxu0 %v2931_v48  ;;  %v2986_v47 = vld [vmem:[%s3829_s1 + $0x2b8] sm:$0xff]   ;;  %v25_v48 = vld [vmem:[%s3830_s0 + $0x20] sm:$0xff] }
  0x2a   :  { %2612 = vmatprep.subr.bf16.mxu1 %v2932_v49  ;;  %v37_v49 = vld [vmem:[%s3830_s0 + $0x80] sm:$0xff] }
  0x2c   :  { %2591 = vmatpush3.bf16.msra.mxu0 %v2933_v50  ;;  %v26_v50 = vld [vmem:[%s3830_s0 + $0x28] sm:$0xff] }
  0x2d   :  { %2613 = vmatpush3.bf16.msra.mxu1 %v2934_v51  ;;  %2592 = vmatprep.subr.bf16.mxu0 %v2935_v52  ;;  %v38_v51 = vld [vmem:[%s3830_s0 + $0x88] sm:$0xff]  ;;  %v2333_v52 = vcombine.low %v25_v48, %v37_v49 }
  0x2e   :  { %2614 = vmatprep.subr.bf16.mxu1 %v2936_v53  ;;  %v2334_v53 = vcombine.high %v25_v48, %v37_v49  ;;  %v3035_v48 = vld [vmem:[%s3829_s1 + $0x460] sm:$0xff]  }
  0x2f   :  { %v3036_v49 = vld [vmem:[%s3829_s1 + $0x4e0] sm:$0xff]  }
  0x30   :  { %2593 = vmatpush3.bf16.msra.mxu0 %v2937_v54  ;;  %v2335_v54 = vcombine.low %v26_v50, %v38_v51 }
  0x31   :  { %2615 = vmatpush3.bf16.msra.mxu1 %v2938_v55  ;;  %2594 = vmatprep.subr.bf16.mxu0 %v2939_v56  ;;  %v2336_v55 = vcombine.high %v26_v50, %v38_v51  ;;  %v2987_v56 = vld [vmem:[%s3829_s1 + $0x340] sm:$0xff]  }
  0x32   :  { %2616 = vmatprep.subr.bf16.mxu1 %v2940_v57  ;;  %v2988_v57 = vld [vmem:[%s3829_s1 + $0x3c0] sm:$0xff]  }
  0x33   :  { %v3037_v50 = vld [vmem:[%s3829_s1 + $0x420] sm:$0xff]  }
  0x34   :  { %2595 = vmatpush3.bf16.msra.mxu0 %v2941_v58  ;;  %v2989_v58 = vld [vmem:[%s3829_s1 + $0x300] sm:$0xff]  }
  0x35   :  { %2617 = vmatpush3.bf16.msra.mxu1 %v2942_v59  ;;  %2596 = vmatprep.subr.bf16.mxu0 %v2943_v60  ;;  %v2990_v59 = vld [vmem:[%s3829_s1 + $0x380] sm:$0xff]   ;;  %v2991_v60 = vld [vmem:[%s3829_s1 + $0x348] sm:$0xff]  }
  0x36   :  { %2618 = vmatprep.subr.bf16.mxu1 %v2944_v61  ;;  %v2992_v61 = vld [vmem:[%s3829_s1 + $0x3c8] sm:$0xff]   ;;  %v3038_v51 = vld [vmem:[%s3829_s1 + $0x4a0] sm:$0xff]  }
  0x38   :  { %2597 = vmatpush3.bf16.msra.mxu0 %v2945_v62  ;;  %v2993_v62 = vld [vmem:[%s3829_s1 + $0x308] sm:$0xff]  }
  0x39   :  { %2619 = vmatpush3.bf16.msra.mxu1 %v2946_v63  ;;  %2598 = vmatprep.subr.bf16.mxu0 %v2947_v0  ;;  %v2994_v63 = vld [vmem:[%s3829_s1 + $0x388] sm:$0xff]   ;;  %v2995_v0 = vld [vmem:[%s3829_s1 + $0x350] sm:$0xff]  }
  0x3a   :  { %2620 = vmatprep.subr.bf16.mxu1 %v2948_v1  ;;  %v2996_v1 = vld [vmem:[%s3829_s1 + $0x3d0] sm:$0xff]  }
  0x3c   :  { %2599 = vmatpush3.bf16.msra.mxu0 %v2949_v2  ;;  %v2997_v2 = vld [vmem:[%s3829_s1 + $0x310] sm:$0xff]  }
  0x3d   :  { %2621 = vmatpush3.bf16.msra.mxu1 %v2950_v3  ;;  %2600 = vmatprep.subr.bf16.mxu0 %v2951_v4  ;;  %v2998_v3 = vld [vmem:[%s3829_s1 + $0x390] sm:$0xff]   ;;  %v2999_v4 = vld [vmem:[%s3829_s1 + $0x358] sm:$0xff]  }
  0x3e   :  { %2622 = vmatprep.subr.bf16.mxu1 %v2952_v5  ;;  %v3000_v5 = vld [vmem:[%s3829_s1 + $0x3d8] sm:$0xff]  }
  0x40   :  { %2601 = vmatpush3.bf16.msra.mxu0 %v2953_v6  ;;  %v3001_v6 = vld [vmem:[%s3829_s1 + $0x318] sm:$0xff]  }
  0x41   :  { %2623 = vmatpush3.bf16.msra.mxu1 %v2954_v7  ;;  %2630 = vmatprep.subr.bf16.mxu0 %v2955_v16  ;;  %v3002_v7 = vld [vmem:[%s3829_s1 + $0x398] sm:$0xff]   ;;  %v3011_v16 = vld [vmem:[%s3829_s1 + $0x370] sm:$0xff]  }
  0x42   :  { %2652 = vmatprep.subr.bf16.mxu1 %v2956_v17  ;;  %v3012_v17 = vld [vmem:[%s3829_s1 + $0x3f0] sm:$0xff]  }
  0x43   :  { %1823 = vmatmul.mubr.bf16.vlgmr.msra.gmra.mrb[4].mxu0 %v2329_v10  ;;  %v3005_v10 = vld [vmem:[%s3829_s1 + $0x320] sm:$0xff]  }
  0x44   :  { %1864 = vmatmul.mubr.bf16.vlgmr.msra.gmra.mrb[4].mxu1 %v2331_v14  ;;  %2631 = vmatpush3.bf16.msra.mxu0 %v2957_v18  ;;  %v3009_v14 = vld [vmem:[%s3829_s1 + $0x328] sm:$0xff]   ;;  %v3013_v18 = vld [vmem:[%s3829_s1 + $0x330] sm:$0xff]  }
  0x45   :  { %2653 = vmatpush3.bf16.msra.mxu1 %v2958_v19  ;;  %2632 = vmatprep.subr.bf16.mxu0 %v2959_v20  ;;  %v3014_v19 = vld [vmem:[%s3829_s1 + $0x3b0] sm:$0xff]   ;;  %v3015_v20 = vld [vmem:[%s3829_s1 + $0x378] sm:$0xff]  }
  0x46   :  { %2654 = vmatprep.subr.bf16.mxu1 %v2960_v21  ;;  %1904 = vmatprep.mubr.bf16.mxu0 %v2334_v53  ;;  %v3016_v21 = vld [vmem:[%s3829_s1 + $0x3f8] sm:$0xff]   ;;  %v3040_v53 = vld [vmem:[%s3829_s1 + $0x4e8] sm:$0xff]  }
  0x47   :  { %1945 = vmatprep.mubr.bf16.mxu1 %v2336_v55  ;;  %v3042_v55 = vld [vmem:[%s3829_s1 + $0x4a8] sm:$0xff]  }
  0x48   :  { %2633 = vmatpush3.bf16.msra.mxu0 %v2961_v22  ;;  %v3017_v22 = vld [vmem:[%s3829_s1 + $0x338] sm:$0xff]  }
  0x49   :  { %2655 = vmatpush3.bf16.msra.mxu1 %v2962_v23  ;;  %2634 = vmatprep.subr.bf16.mxu0 %v2963_v24  ;;  %v3018_v23 = vld [vmem:[%s3829_s1 + $0x3b8] sm:$0xff]   ;;  %v27_v24 = vld [vmem:[%s3830_s0 + $0x30] sm:$0xff] }
  0x4a   :  { %2656 = vmatprep.subr.bf16.mxu1 %v2964_v25  ;;  %v39_v25 = vld [vmem:[%s3830_s0 + $0x90] sm:$0xff] }
  0x4c   :  { %2635 = vmatpush3.bf16.msra.mxu0 %v2965_v26  ;;  %v28_v26 = vld [vmem:[%s3830_s0 + $0x38] sm:$0xff] }
  0x4d   :  { %2657 = vmatpush3.bf16.msra.mxu1 %v2966_v27  ;;  %2636 = vmatprep.subr.bf16.mxu0 %v2967_v28  ;;  %v2337_v27 = vcombine.low %v27_v24, %v39_v25  ;;  %v2338_v28 = vcombine.high %v27_v24, %v39_v25  ;;  %v3067_v24 = vld [vmem:[%s3829_s1 + $0x560] sm:$0xff]  }
  0x4e   :  { %2658 = vmatprep.subr.bf16.mxu1 %v2968_v29  ;;  %v40_v29 = vld [vmem:[%s3830_s0 + $0x98] sm:$0xff]  ;;  %v3068_v25 = vld [vmem:[%s3829_s1 + $0x5e0] sm:$0xff]  }
  0x50   :  { %2637 = vmatpush3.bf16.msra.mxu0 %v2969_v30  ;;  %v2339_v30 = vcombine.low %v28_v26, %v40_v29 }
  0x51   :  { %2659 = vmatpush3.bf16.msra.mxu1 %v2970_v31  ;;  %2638 = vmatprep.subr.bf16.mxu0 %v2971_v32  ;;  %v2340_v31 = vcombine.high %v28_v26, %v40_v29  ;;  %v3019_v32 = vld [vmem:[%s3829_s1 + $0x440] sm:$0xff]   ;;  %v3072_v29 = vld [vmem:[%s3829_s1 + $0x5e8] sm:$0xff]  }
  0x52   :  { %2660 = vmatprep.subr.bf16.mxu1 %v2972_v33  ;;  %v3020_v33 = vld [vmem:[%s3829_s1 + $0x4c0] sm:$0xff]  }
  0x53   :  { %v3069_v26 = vld [vmem:[%s3829_s1 + $0x520] sm:$0xff]  }
  0x54   :  { %2639 = vmatpush3.bf16.msra.mxu0 %v2973_v34  ;;  %v3021_v34 = vld [vmem:[%s3829_s1 + $0x400] sm:$0xff]  }
  0x55   :  { %2661 = vmatpush3.bf16.msra.mxu1 %v2974_v35  ;;  %2640 = vmatprep.subr.bf16.mxu0 %v2975_v36  ;;  %v3022_v35 = vld [vmem:[%s3829_s1 + $0x480] sm:$0xff]   ;;  %v3023_v36 = vld [vmem:[%s3829_s1 + $0x448] sm:$0xff]  }
  0x56   :  { %2662 = vmatprep.subr.bf16.mxu1 %v2976_v37  ;;  %v3024_v37 = vld [vmem:[%s3829_s1 + $0x4c8] sm:$0xff]  }
  0x58   :  { %2641 = vmatpush3.bf16.msra.mxu0 %v2977_v38  ;;  %v3025_v38 = vld [vmem:[%s3829_s1 + $0x408] sm:$0xff]  }
  0x59   :  { %2663 = vmatpush3.bf16.msra.mxu1 %v2978_v39  ;;  %2642 = vmatprep.subr.bf16.mxu0 %v2979_v40  ;;  %v3026_v39 = vld [vmem:[%s3829_s1 + $0x488] sm:$0xff]   ;;  %v3027_v40 = vld [vmem:[%s3829_s1 + $0x450] sm:$0xff]  }
  0x5a   :  { %2664 = vmatprep.subr.bf16.mxu1 %v2980_v41  ;;  %v3028_v41 = vld [vmem:[%s3829_s1 + $0x4d0] sm:$0xff]  }
  0x5c   :  { %2643 = vmatpush3.bf16.msra.mxu0 %v2981_v42  ;;  %v3029_v42 = vld [vmem:[%s3829_s1 + $0x410] sm:$0xff]  }
  0x5d   :  { %2665 = vmatpush3.bf16.msra.mxu1 %v2982_v43  ;;  %2644 = vmatprep.subr.bf16.mxu0 %v2983_v44  ;;  %v3030_v43 = vld [vmem:[%s3829_s1 + $0x490] sm:$0xff]   ;;  %v3031_v44 = vld [vmem:[%s3829_s1 + $0x458] sm:$0xff]  }
  0x5e   :  { %2666 = vmatprep.subr.bf16.mxu1 %v2984_v45  ;;  %v3032_v45 = vld [vmem:[%s3829_s1 + $0x4d8] sm:$0xff]  }
  0x60   :  { %2645 = vmatpush3.bf16.msra.mxu0 %v2985_v46  ;;  %v3033_v46 = vld [vmem:[%s3829_s1 + $0x418] sm:$0xff]  }
  0x61   :  { %2667 = vmatpush3.bf16.msra.mxu1 %v2986_v47  ;;  %2674 = vmatprep.subr.bf16.mxu0 %v2987_v56  ;;  %v3034_v47 = vld [vmem:[%s3829_s1 + $0x498] sm:$0xff]   ;;  %v3043_v56 = vld [vmem:[%s3829_s1 + $0x470] sm:$0xff]  }
  0x62   :  { %2696 = vmatprep.subr.bf16.mxu1 %v2988_v57  ;;  %v3044_v57 = vld [vmem:[%s3829_s1 + $0x4f0] sm:$0xff]  }
  0x63   :  { %1905 = vmatmul.mubr.bf16.vlgmr.msra.gmra.mrb[8].mxu0 %v2333_v52  ;;  %v3039_v52 = vld [vmem:[%s3829_s1 + $0x468] sm:$0xff]  }
  0x64   :  { %1946 = vmatmul.mubr.bf16.vlgmr.msra.gmra.mrb[8].mxu1 %v2335_v54  ;;  %2675 = vmatpush3.bf16.msra.mxu0 %v2989_v58  ;;  %v3041_v54 = vld [vmem:[%s3829_s1 + $0x428] sm:$0xff]   ;;  %v3045_v58 = vld [vmem:[%s3829_s1 + $0x430] sm:$0xff]  }
  0x65   :  { %2697 = vmatpush3.bf16.msra.mxu1 %v2990_v59  ;;  %2676 = vmatprep.subr.bf16.mxu0 %v2991_v60  ;;  %v3046_v59 = vld [vmem:[%s3829_s1 + $0x4b0] sm:$0xff]   ;;  %v3047_v60 = vld [vmem:[%s3829_s1 + $0x478] sm:$0xff]  }
  0x66   :  { %2698 = vmatprep.subr.bf16.mxu1 %v2992_v61  ;;  %1986 = vmatprep.mubr.bf16.mxu0 %v2338_v28  ;;  %v3048_v61 = vld [vmem:[%s3829_s1 + $0x4f8] sm:$0xff]   ;;  %v3071_v28 = vld [vmem:[%s3829_s1 + $0x568] sm:$0xff]  }
  0x67   :  { %2027 = vmatprep.mubr.bf16.mxu1 %v2340_v31  ;;  %v3074_v31 = vld [vmem:[%s3829_s1 + $0x5a8] sm:$0xff]  }
  0x68   :  { %2677 = vmatpush3.bf16.msra.mxu0 %v2993_v62  ;;  %v3049_v62 = vld [vmem:[%s3829_s1 + $0x438] sm:$0xff]  }
  0x69   :  { %2699 = vmatpush3.bf16.msra.mxu1 %v2994_v63  ;;  %2678 = vmatprep.subr.bf16.mxu0 %v2995_v0  ;;  %v3050_v63 = vld [vmem:[%s3829_s1 + $0x4b8] sm:$0xff]   ;;  %v29_v0 = vld [vmem:[%s3830_s0 + $0x40] sm:$0xff] }
  0x6a   :  { %2700 = vmatprep.subr.bf16.mxu1 %v2996_v1  ;;  %v41_v1 = vld [vmem:[%s3830_s0 + $0xa0] sm:$0xff] }
  0x6c   :  { %2679 = vmatpush3.bf16.msra.mxu0 %v2997_v2  ;;  %v2341_v2 = vcombine.low %v29_v0, %v41_v1 }
  0x6d   :  { %2701 = vmatpush3.bf16.msra.mxu1 %v2998_v3  ;;  %2680 = vmatprep.subr.bf16.mxu0 %v2999_v4  ;;  %v2342_v3 = vcombine.high %v29_v0, %v41_v1  ;;  %v30_v4 = vld [vmem:[%s3830_s0 + $0x48] sm:$0xff]  ;;  %v2202_v1 = vld [vmem:[%s3832_s3] sm:$0xff] }
  0x6e   :  { %2702 = vmatprep.subr.bf16.mxu1 %v3000_v5  ;;  %v42_v5 = vld [vmem:[%s3830_s0 + $0xa8] sm:$0xff] }
  0x70   :  { %2681 = vmatpush3.bf16.msra.mxu0 %v3001_v6  ;;  %v2343_v6 = vcombine.low %v30_v4, %v42_v5 }
  0x71   :  { %2703 = vmatpush3.bf16.msra.mxu1 %v3002_v7  ;;  %2682 = vmatprep.subr.bf16.mxu0 %v3003_v8  ;;  %v2344_v7 = vcombine.high %v30_v4, %v42_v5  ;;  %v3051_v8 = vld [vmem:[%s3829_s1 + $0x540] sm:$0xff]   ;;  %v2205_v5 = vld [vmem:[%s3832_s3 + $0x18] sm:$0xff] }
  0x72   :  { %2704 = vmatprep.subr.bf16.mxu1 %v3004_v9  ;;  %v3052_v9 = vld [vmem:[%s3829_s1 + $0x5c0] sm:$0xff]  }
  0x74   :  { %2683 = vmatpush3.bf16.msra.mxu0 %v3005_v10  ;;  %v3053_v10 = vld [vmem:[%s3829_s1 + $0x500] sm:$0xff]  }
  0x75   :  { %2705 = vmatpush3.bf16.msra.mxu1 %v3006_v11  ;;  %2684 = vmatprep.subr.bf16.mxu0 %v3007_v12  ;;  %v3054_v11 = vld [vmem:[%s3829_s1 + $0x580] sm:$0xff]   ;;  %v3055_v12 = vld [vmem:[%s3829_s1 + $0x548] sm:$0xff]  }
  0x76   :  { %2706 = vmatprep.subr.bf16.mxu1 %v3008_v13  ;;  %v3056_v13 = vld [vmem:[%s3829_s1 + $0x5c8] sm:$0xff]  }
  0x78   :  { %2685 = vmatpush3.bf16.msra.mxu0 %v3009_v14  ;;  %v3057_v14 = vld [vmem:[%s3829_s1 + $0x508] sm:$0xff]  }
  0x79   :  { %2707 = vmatpush3.bf16.msra.mxu1 %v3010_v15  ;;  %2686 = vmatprep.subr.bf16.mxu0 %v3011_v16  ;;  %v3058_v15 = vld [vmem:[%s3829_s1 + $0x588] sm:$0xff]   ;;  %v3059_v16 = vld [vmem:[%s3829_s1 + $0x550] sm:$0xff]  }
  0x7a   :  { %2708 = vmatprep.subr.bf16.mxu1 %v3012_v17  ;;  %v3060_v17 = vld [vmem:[%s3829_s1 + $0x5d0] sm:$0xff]  }
  0x7c   :  { %2687 = vmatpush3.bf16.msra.mxu0 %v3013_v18  ;;  %v3061_v18 = vld [vmem:[%s3829_s1 + $0x510] sm:$0xff]  }
  0x7d   :  { %2709 = vmatpush3.bf16.msra.mxu1 %v3014_v19  ;;  %2688 = vmatprep.subr.bf16.mxu0 %v3015_v20  ;;  %v3062_v19 = vld [vmem:[%s3829_s1 + $0x590] sm:$0xff]   ;;  %v3063_v20 = vld [vmem:[%s3829_s1 + $0x558] sm:$0xff]  }
  0x7e   :  { %2710 = vmatprep.subr.bf16.mxu1 %v3016_v21  ;;  %v3064_v21 = vld [vmem:[%s3829_s1 + $0x5d8] sm:$0xff]  }
  0x80   :  { %2689 = vmatpush3.bf16.msra.mxu0 %v3017_v22  ;;  %v3065_v22 = vld [vmem:[%s3829_s1 + $0x518] sm:$0xff]  }
  0x81   :  { %2711 = vmatpush3.bf16.msra.mxu1 %v3018_v23  ;;  %2718 = vmatprep.subr.bf16.mxu0 %v3019_v32  ;;  %v3066_v23 = vld [vmem:[%s3829_s1 + $0x598] sm:$0xff]   ;;  %v3075_v32 = vld [vmem:[%s3829_s1 + $0x570] sm:$0xff]  }
  0x82   :  { %2740 = vmatprep.subr.bf16.mxu1 %v3020_v33  ;;  %v3076_v33 = vld [vmem:[%s3829_s1 + $0x5f0] sm:$0xff]  }
  0x83   :  { %1987 = vmatmul.mubr.bf16.vlgmr.msra.gmra.mrb[12].mxu0 %v2337_v27  ;;  %v3070_v27 = vld [vmem:[%s3829_s1 + $0x5a0] sm:$0xff]  }
  0x84   :  { %2028 = vmatmul.mubr.bf16.vlgmr.msra.gmra.mrb[12].mxu1 %v2339_v30  ;;  %2719 = vmatpush3.bf16.msra.mxu0 %v3021_v34  ;;  %v3073_v30 = vld [vmem:[%s3829_s1 + $0x528] sm:$0xff]   ;;  %v3077_v34 = vld [vmem:[%s3829_s1 + $0x530] sm:$0xff]  }
  0x85   :  { %2741 = vmatpush3.bf16.msra.mxu1 %v3022_v35  ;;  %2720 = vmatprep.subr.bf16.mxu0 %v3023_v36  ;;  %v3078_v35 = vld [vmem:[%s3829_s1 + $0x5b0] sm:$0xff]   ;;  %v3079_v36 = vld [vmem:[%s3829_s1 + $0x578] sm:$0xff]  }
  0x86   :  { %2742 = vmatprep.subr.bf16.mxu1 %v3024_v37  ;;  %2068 = vmatprep.mubr.bf16.mxu0 %v2342_v3  ;;  %v3080_v37 = vld [vmem:[%s3829_s1 + $0x5f8] sm:$0xff]   ;;  %v2204_v3 = vld [vmem:[%s3832_s3 + $0x10] sm:$0xff] }
  0x87   :  { %2109 = vmatprep.mubr.bf16.mxu1 %v2344_v7  ;;  %v2206_v7 = vld [vmem:[%s3832_s3 + $0x20] sm:$0xff] }
  0x88   :  { %2721 = vmatpush3.bf16.msra.mxu0 %v3025_v38  ;;  %v3081_v38 = vld [vmem:[%s3829_s1 + $0x538] sm:$0xff]  }
  0x89   :  { %2743 = vmatpush3.bf16.msra.mxu1 %v3026_v39  ;;  %2722 = vmatprep.subr.bf16.mxu0 %v3027_v40  ;;  %v3082_v39 = vld [vmem:[%s3829_s1 + $0x5b8] sm:$0xff]   ;;  %v31_v40 = vld [vmem:[%s3830_s0 + $0x50] sm:$0xff] }
  0x8a   :  { %2744 = vmatprep.subr.bf16.mxu1 %v3028_v41  ;;  %v43_v41 = vld [vmem:[%s3830_s0 + $0xb0] sm:$0xff] }
  0x8c   :  { %2723 = vmatpush3.bf16.msra.mxu0 %v3029_v42  ;;  %v32_v42 = vld [vmem:[%s3830_s0 + $0x58] sm:$0xff] }
  0x8d   :  { %2745 = vmatpush3.bf16.msra.mxu1 %v3030_v43  ;;  %2724 = vmatprep.subr.bf16.mxu0 %v3031_v44  ;;  %v44_v43 = vld [vmem:[%s3830_s0 + $0xb8] sm:$0xff]  ;;  %v2345_v44 = vcombine.low %v31_v40, %v43_v41 }
  0x8e   :  { %2746 = vmatprep.subr.bf16.mxu1 %v3032_v45  ;;  %v2346_v45 = vcombine.high %v31_v40, %v43_v41 }
  0x90   :  { %2725 = vmatpush3.bf16.msra.mxu0 %v3033_v46  ;;  %v2347_v46 = vcombine.low %v32_v42, %v44_v43 }
  0x91   :  { %2747 = vmatpush3.bf16.msra.mxu1 %v3034_v47  ;;  %2726 = vmatprep.subr.bf16.mxu0 %v3035_v48  ;;  %v2348_v47 = vcombine.high %v32_v42, %v44_v43 }
  0x92   :  { %2748 = vmatprep.subr.bf16.mxu1 %v3036_v49 }
  0x94   :  { %2727 = vmatpush3.bf16.msra.mxu0 %v3037_v50  ;;  %v2324_v50 = vld [vmem:[%s3831_s2] ss:$0 sm:$0xff] }
  0x95   :  { %2749 = vmatpush3.bf16.msra.mxu1 %v3038_v51  ;;  %2728 = vmatprep.subr.bf16.mxu0 %v3039_v52 }
  0x96   :  { %2750 = vmatprep.subr.bf16.mxu1 %v3040_v53 }
  0x98   :  { %2729 = vmatpush3.bf16.msra.mxu0 %v3041_v54 }
  0x99   :  { %2751 = vmatpush3.bf16.msra.mxu1 %v3042_v55  ;;  %2730 = vmatprep.subr.bf16.mxu0 %v3043_v56 }
  0x9a   :  { %2752 = vmatprep.subr.bf16.mxu1 %v3044_v57 }
  0x9c   :  { %2731 = vmatpush3.bf16.msra.mxu0 %v3045_v58 }
  0x9d   :  { %2753 = vmatpush3.bf16.msra.mxu1 %v3046_v59  ;;  %2732 = vmatprep.subr.bf16.mxu0 %v3047_v60 }
  0x9e   :  { %2754 = vmatprep.subr.bf16.mxu1 %v3048_v61 }
  0xa0   :  { %2733 = vmatpush3.bf16.msra.mxu0 %v3049_v62 }
  0xa1   :  { %2755 = vmatpush3.bf16.msra.mxu1 %v3050_v63  ;;  %2762 = vmatprep.subr.bf16.mxu0 %v3051_v8  ;;  %v2207_v8 = vld [vmem:[%s3832_s3 + $0x28] sm:$0xff] }
  0xa2   :  { %2784 = vmatprep.subr.bf16.mxu1 %v3052_v9  ;;  %v2867_v9 = vpack.c.bf16 %v2207_v8, %v2206_v7 }
  0xa3   :  { %2069 = vmatmul.mubr.bf16.vlgmr.msra.gmra.mrb[16].mxu0 %v2341_v2  ;;  %v2203_v2 = vld [vmem:[%s3832_s3 + $0x8] sm:$0xff] }
  0xa4   :  { %2110 = vmatmul.mubr.bf16.vlgmr.msra.gmra.mrb[16].mxu1 %v2343_v6  ;;  %2763 = vmatpush3.bf16.msra.mxu0 %v3053_v10  ;;  %v2859_v4 = vpack.c.bf16 %v2203_v2, %v2202_v1  ;;  %v2863_v6 = vpack.c.bf16 %v2205_v5, %v2204_v3  ;;  %v2208_v10 = vld [vmem:[%s3832_s3 + $0x30] sm:$0xff] }
  0xa5   :  { %2785 = vmatpush3.bf16.msra.mxu1 %v3054_v11  ;;  %2764 = vmatprep.subr.bf16.mxu0 %v3055_v12  ;;  %v2209_v11 = vld [vmem:[%s3832_s3 + $0x38] sm:$0xff] }
  0xa6   :  { %2786 = vmatprep.subr.bf16.mxu1 %v3056_v13  ;;  %2150 = vmatprep.mubr.bf16.mxu0 %v2346_v45  ;;  %v2871_v12 = vpack.c.bf16 %v2209_v11, %v2208_v10  ;;  %v2210_v13 = vld [vmem:[%s3832_s3 + $0x40] sm:$0xff] }
  0xa7   :  { %2191 = vmatprep.mubr.bf16.mxu1 %v2348_v47 }
  0xa8   :  { %2765 = vmatpush3.bf16.msra.mxu0 %v3057_v14  ;;  %v2211_v14 = vld [vmem:[%s3832_s3 + $0x48] sm:$0xff] }
  0xa9   :  { %2787 = vmatpush3.bf16.msra.mxu1 %v3058_v15  ;;  %2766 = vmatprep.subr.bf16.mxu0 %v3059_v16  ;;  %v2875_v15 = vpack.c.bf16 %v2211_v14, %v2210_v13 }
  0xaa   :  { %2788 = vmatprep.subr.bf16.mxu1 %v3060_v17 }
  0xac   :  { %2767 = vmatpush3.bf16.msra.mxu0 %v3061_v18 }
  0xad   :  { %2789 = vmatpush3.bf16.msra.mxu1 %v3062_v19  ;;  %2768 = vmatprep.subr.bf16.mxu0 %v3063_v20 }
  0xae   :  { %2790 = vmatprep.subr.bf16.mxu1 %v3064_v21 }
  0xb0   :  { %2769 = vmatpush3.bf16.msra.mxu0 %v3065_v22 }
  0xb1   :  { %2791 = vmatpush3.bf16.msra.mxu1 %v3066_v23  ;;  %2770 = vmatprep.subr.bf16.mxu0 %v3067_v24 }
  0xb2   :  { %2792 = vmatprep.subr.bf16.mxu1 %v3068_v25  ;;  %v2212_v25 = vld [vmem:[%s3832_s3 + $0x50] sm:$0xff] }
  0xb4   :  { %2771 = vmatpush3.bf16.msra.mxu0 %v3069_v26  ;;  %v2213_v26 = vld [vmem:[%s3832_s3 + $0x58] sm:$0xff] }
  0xb5   :  { %2793 = vmatpush3.bf16.msra.mxu1 %v3070_v27  ;;  %2772 = vmatprep.subr.bf16.mxu0 %v3071_v28 }
  0xb6   :  { %2794 = vmatprep.subr.bf16.mxu1 %v3072_v29 }
  0xb8   :  { %2773 = vmatpush3.bf16.msra.mxu0 %v3073_v30  ;;  %v2879_v30 = vpack.c.bf16 %v2213_v26, %v2212_v25 }
  0xb9   :  { %2795 = vmatpush3.bf16.msra.mxu1 %v3074_v31  ;;  %2774 = vmatprep.subr.bf16.mxu0 %v3075_v32 }
  0xba   :  { %2796 = vmatprep.subr.bf16.mxu1 %v3076_v33 }
  0xbc   :  { %2775 = vmatpush3.bf16.msra.mxu0 %v3077_v34  ;;  %v2214_v34 = vld [vmem:[%s3832_s3 + $0x60] sm:$0xff] }
  0xbd   :  { %2797 = vmatpush3.bf16.msra.mxu1 %v3078_v35  ;;  %2776 = vmatprep.subr.bf16.mxu0 %v3079_v36  ;;  %v2215_v35 = vld [vmem:[%s3832_s3 + $0x68] sm:$0xff] }
  0xbe   :  { %2798 = vmatprep.subr.bf16.mxu1 %v3080_v37  ;;  %v2883_v37 = vpack.c.bf16 %v2215_v35, %v2214_v34 }
  0xc0   :  { %2777 = vmatpush3.bf16.msra.mxu0 %v3081_v38  ;;  %v2216_v38 = vld [vmem:[%s3832_s3 + $0x70] sm:$0xff] }
  0xc1   :  { %2799 = vmatpush3.bf16.msra.mxu1 %v3082_v39  ;;  %2860 = vmatprep.subr.bf16.mxu0 %v2859_v4  ;;  %v2217_v39 = vld [vmem:[%s3832_s3 + $0x78] sm:$0xff] }
  0xc2   :  { %v2887_v40 = vpack.c.bf16 %v2217_v39, %v2216_v38 }
  0xc3   :  { %2151 = vmatmul.mubr.bf16.vlgmr.msra.gmra.mrb[20].mxu0 %v2345_v44 }
  0xc4   :  { %2192 = vmatmul.mubr.bf16.vlgmr.msra.gmra.mrb[20].mxu1 %v2347_v46  ;;  %2862 = vmatpush3.bf16.msra.mxu0 %v2859_v4 }
  0xc5   :  { %2864 = vmatprep.subr.bf16.mxu0 %v2863_v6 }
  0xc8   :  { %2866 = vmatpush3.bf16.msra.mxu0 %v2863_v6 }
  0xc9   :  { %2868 = vmatprep.subr.bf16.mxu0 %v2867_v9 }
  0xcc   :  { %2870 = vmatpush3.bf16.msra.mxu0 %v2867_v9 }
  0xcd   :  { %2872 = vmatprep.subr.bf16.mxu0 %v2871_v12 }
  0xd0   :  { %2874 = vmatpush3.bf16.msra.mxu0 %v2871_v12 }
  0xd1   :  { %2876 = vmatprep.subr.bf16.mxu0 %v2875_v15 }
  0xd4   :  { %2878 = vmatpush3.bf16.msra.mxu0 %v2875_v15 }
  0xd5   :  { %2880 = vmatprep.subr.bf16.mxu0 %v2879_v30 }
  0xd8   :  { %2882 = vmatpush3.bf16.msra.mxu0 %v2879_v30 }
  0xd9   :  { %2884 = vmatprep.subr.bf16.mxu0 %v2883_v37 }
  0xdc   :  { %2886 = vmatpush3.bf16.msra.mxu0 %v2883_v37 }
  0xdd   :  { %2888 = vmatprep.subr.bf16.mxu0 %v2887_v40 }
  0xe0   :  { %2890 = vmatpush3.bf16.msra.mxu0 %v2887_v40 }
  0xf6   :  { %v2558_v48 = vpop.f32.mrb[0].mxu0 }
  0xf7   :  { %v2580_v49 = vpop.f32.mrb[0].mxu1  ;;  %v2559_v51 = vpop.f32.mrb[1].mxu0 }
  0xf8   :  { %v2560_v52 = vadd.f32 %v2559_v51, %v2558_v48  ;;  %v2581_v53 = vpop.f32.mrb[1].mxu1  ;;  %v2561_v54 = vpop.f32.mrb[2].mxu0 }
  0xf9   :  { %v2582_v55 = vadd.f32 %v2581_v53, %v2580_v49  ;;  %v2583_v56 = vpop.f32.mrb[2].mxu1  ;;  %v2562_v57 = vpop.f32.mrb[3].mxu0 }
  0xfa   :  { %v1743_v58 = vadd.f32 %v2560_v52, %v2324_v50  ;;  %v2563_v59 = vadd.f32 %v2562_v57, %v2561_v54  ;;  %v2584_v60 = vpop.f32.mrb[3].mxu1 }
  0xfb   :  { %v2585_v61 = vadd.f32 %v2584_v60, %v2583_v56 }
  0xfc   :  { %v1784_v62 = vadd.f32 %v2582_v55, %v1743_v58  ;;  %v1746_v63 = vadd.f32 %v2563_v59, %v2324_v50 }
  0xfe   :  { %v1787_v0 = vadd.f32 %v2585_v61, %v1746_v63 }
 0x116   :  { %v2602_v16 = vpop.f32.mrb[4].mxu0 }
 0x117   :  { %v2624_v17 = vpop.f32.mrb[4].mxu1  ;;  %v2603_v18 = vpop.f32.mrb[5].mxu0 }
 0x118   :  { %v2604_v19 = vadd.f32 %v2603_v18, %v2602_v16  ;;  %v2625_v20 = vpop.f32.mrb[5].mxu1  ;;  %v2605_v21 = vpop.f32.mrb[6].mxu0 }
 0x119   :  { %v2626_v22 = vadd.f32 %v2625_v20, %v2624_v17  ;;  %v2627_v23 = vpop.f32.mrb[6].mxu1  ;;  %v2606_v24 = vpop.f32.mrb[7].mxu0 }
 0x11a   :  { %v1825_v27 = vadd.f32 %v2604_v19, %v1784_v62  ;;  %v2607_v28 = vadd.f32 %v2606_v24, %v2605_v21  ;;  %v2628_v29 = vpop.f32.mrb[7].mxu1 }
 0x11b   :  { %v2629_v31 = vadd.f32 %v2628_v29, %v2627_v23 }
 0x11c   :  { %v1866_v32 = vadd.f32 %v2626_v22, %v1825_v27  ;;  %v1828_v33 = vadd.f32 %v2607_v28, %v1787_v0 }
 0x11e   :  { %v1869_v36 = vadd.f32 %v2629_v31, %v1828_v33 }
 0x136   :  { %v2646_v41 = vpop.f32.mrb[8].mxu0 }
 0x137   :  { %v2668_v42 = vpop.f32.mrb[8].mxu1  ;;  %v2647_v43 = vpop.f32.mrb[9].mxu0 }
 0x138   :  { %v2669_v44 = vpop.f32.mrb[9].mxu1  ;;  %v2648_v45 = vadd.f32 %v2647_v43, %v2646_v41  ;;  %v2649_v47 = vpop.f32.mrb[10].mxu0  ;;  %v2541_v43 = vld [vmem:[%s3833_s4] ss:$0 sm:$0xff] }
 0x139   :  { %v2670_v46 = vadd.f32 %v2669_v44, %v2668_v42  ;;  %v2671_v48 = vpop.f32.mrb[10].mxu1  ;;  %v2650_v49 = vpop.f32.mrb[11].mxu0 }
 0x13a   :  { %v2672_v50 = vpop.f32.mrb[11].mxu1  ;;  %v1907_v51 = vadd.f32 %v2648_v45, %v1866_v32  ;;  %v2651_v52 = vadd.f32 %v2650_v49, %v2649_v47 }
 0x13b   :  { %v2673_v53 = vadd.f32 %v2672_v50, %v2671_v48 }
 0x13c   :  { %v1948_v54 = vadd.f32 %v2670_v46, %v1907_v51  ;;  %v1910_v55 = vadd.f32 %v2651_v52, %v1869_v36 }
 0x13e   :  { %v1951_v56 = vadd.f32 %v2673_v53, %v1910_v55 }
 0x156   :  { %v2690_v57 = vpop.f32.mrb[12].mxu0 }
 0x157   :  { %v2712_v58 = vpop.f32.mrb[12].mxu1  ;;  %v2691_v59 = vpop.f32.mrb[13].mxu0 }
 0x158   :  { %v2692_v60 = vadd.f32 %v2691_v59, %v2690_v57  ;;  %v2713_v61 = vpop.f32.mrb[13].mxu1  ;;  %v2693_v62 = vpop.f32.mrb[14].mxu0 }
 0x159   :  { %v2714_v63 = vadd.f32 %v2713_v61, %v2712_v58  ;;  %v2715_v0 = vpop.f32.mrb[14].mxu1  ;;  %v2694_v1 = vpop.f32.mrb[15].mxu0 }
 0x15a   :  { %v1989_v2 = vadd.f32 %v2692_v60, %v1948_v54  ;;  %v2695_v3 = vadd.f32 %v2694_v1, %v2693_v62  ;;  %v2716_v4 = vpop.f32.mrb[15].mxu1 }
 0x15b   :  { %v2717_v5 = vadd.f32 %v2716_v4, %v2715_v0 }
 0x15c   :  { %v2030_v6 = vadd.f32 %v2714_v63, %v1989_v2  ;;  %v1992_v7 = vadd.f32 %v2695_v3, %v1951_v56 }
 0x15e   :  { %v2033_v8 = vadd.f32 %v2717_v5, %v1992_v7 }
 0x176   :  { %v2734_v9 = vpop.f32.mrb[16].mxu0 }
 0x177   :  { %v2756_v10 = vpop.f32.mrb[16].mxu1  ;;  %v2735_v11 = vpop.f32.mrb[17].mxu0 }
 0x178   :  { %v2736_v12 = vadd.f32 %v2735_v11, %v2734_v9  ;;  %v2757_v13 = vpop.f32.mrb[17].mxu1  ;;  %v2737_v14 = vpop.f32.mrb[18].mxu0 }
 0x179   :  { %v2758_v15 = vadd.f32 %v2757_v13, %v2756_v10  ;;  %v2759_v16 = vpop.f32.mrb[18].mxu1  ;;  %v2738_v17 = vpop.f32.mrb[19].mxu0 }
 0x17a   :  { %v2071_v18 = vadd.f32 %v2736_v12, %v2030_v6  ;;  %v2739_v19 = vadd.f32 %v2738_v17, %v2737_v14  ;;  %v2760_v20 = vpop.f32.mrb[19].mxu1 }
 0x17b   :  { %v2761_v21 = vadd.f32 %v2760_v20, %v2759_v16 }
 0x17c   :  { %v2112_v22 = vadd.f32 %v2758_v15, %v2071_v18  ;;  %v2074_v23 = vadd.f32 %v2739_v19, %v2033_v8 }
 0x17e   :  { %v2115_v24 = vadd.f32 %v2761_v21, %v2074_v23 }
 0x196   :  { %v2778_v25 = vpop.f32.mrb[20].mxu0 }
 0x197   :  { %v2800_v26 = vpop.f32.mrb[20].mxu1  ;;  %v2779_v27 = vpop.f32.mrb[21].mxu0 }
 0x198   :  { %v2801_v28 = vpop.f32.mrb[21].mxu1  ;;  %v2780_v29 = vadd.f32 %v2779_v27, %v2778_v25  ;;  %v2781_v31 = vpop.f32.mrb[22].mxu0 }
 0x199   :  { %v2802_v30 = vadd.f32 %v2801_v28, %v2800_v26  ;;  %v2803_v32 = vpop.f32.mrb[22].mxu1  ;;  %v2782_v33 = vpop.f32.mrb[23].mxu0 }
 0x19a   :  { %v2804_v34 = vpop.f32.mrb[23].mxu1  ;;  %v2153_v35 = vadd.f32 %v2780_v29, %v2112_v22  ;;  %v2783_v36 = vadd.f32 %v2782_v33, %v2781_v31 }
 0x19b   :  { %v2805_v37 = vadd.f32 %v2804_v34, %v2803_v32 }
 0x19c   :  { %v2194_v38 = vadd.f32 %v2802_v30, %v2153_v35  ;;  %v2156_v39 = vadd.f32 %v2783_v36, %v2115_v24 }
 0x19e   :  { %v2200_v40 = vmax.f32 %v2194_v38, 0.0  ;;  %v2197_v41 = vadd.f32 %v2805_v37, %v2156_v39 }
 0x1a0   :  { %v2201_v42 = vmax.f32 %v2197_v41, 0.0  ;;  %2856 = vmatprep.mubr.f32.mxu0 %v2200_v40 }
 0x1a2   :  { %2857 = vmatmul.mubr.f32.vlgmr.msra.gmra.mrb[24].mxu0 %v2201_v42 }
 0x275   :  { %v2858_v44 = vpop.f32.mrb[24].mxu0 }
 0x276   :  { %v2291_v45 = vpop.f32.mrb[25].mxu0  ;;  %v2297_v47 = vadd.f32 %v2858_v44, %v2541_v43 }
 0x277   :  { %v2292_v46 = vadd.f32 %v2541_v43, %v2291_v45 }
 0x279   :  { %2300 = vmax.xlane.f32.xlu0 %v2292_v46 }
 0x27d   :  { %2302 = vmax.xlane.f32.xlu0 %v2297_v47 }
 0x306   :  { %v2301_v48 = vpop.xlane.xlu0 %2300 }
 0x307   :  { %v2304_v49 = vsub.f32 %v2292_v46, %v2301_v48 }
 0x309   :  { %v2306_v50 = vmul.f32 1.442695, %v2304_v49 }
 0x30a   :  { %v2303_v51 = vpop.xlane.xlu0 %2302 }
 0x30b   :  { %3083 = vpow2.f32 %v2306_v50  ;;  %v2305_v52 = vsub.f32 %v2297_v47, %v2303_v51 }
 0x30d   :  { %v2308_v53 = vmul.f32 1.442695, %v2305_v52 }
 0x30f   :  { %3085 = vpow2.f32 %v2308_v53 }
 0x315   :  { %v3084_v54 = vpop.eup %3083 }
 0x316   :  { %2310 = vadd.xlane.f32.xlu1 %v3084_v54 }
 0x319   :  { %v3086_v55 = vpop.eup %3085 }
 0x31a   :  { %2312 = vadd.xlane.f32.xlu1 %v3086_v55 }
 0x3a3   :  { %v2311_v56 = vpop.xlane.xlu1 %2310 }
 0x3a4   :  { %3087 = vrcp.f32 %v2311_v56 }
 0x3a7   :  { %v2313_v57 = vpop.xlane.xlu1 %2312 }
 0x3a8   :  { %3089 = vrcp.f32 %v2313_v57 }
 0x3ae   :  { %v3088_v58 = vpop.eup %3087 }
 0x3af   :  { %v2316_v59 = vmul.f32 %v3088_v58, %v3084_v54 }
 0x3b1   :  { %2318 = vst [vmem:[%s3834_s5] sm:$0xff] %v2316_v59 }
 0x3b2   :  { %v3090_v60 = vpop.eup %3089 }
 0x3b3   :  { %v2317_v61 = vmul.f32 %v3090_v60, %v3086_v55 }
 0x3b5   :  { %2319 = vst [vmem:[%s3834_s5 + $0x8] sm:$0xff] %v2317_v61 }

</bundles_post_ra>
